<compile_context>
chip_gen: v5e
topology: v5e:2x2
jax: 0.10.0
libtpu: 0.0.40
codegen_flags: <defaults>
</compile_context>

<pallas_src>
import jax
import jax.numpy as jnp
from jax.experimental import pallas as pl
from jax.experimental.pallas import tpu as pltpu

_LANE = 128
# ~2 MiB per block. Double-buffered input + output => ~8 MiB of VMEM, safe on
# v5e (16 MiB scoped), v6e/v7x (32 MiB scoped default, 64 MiB physical v7x).
_TARGET_BLOCK_BYTES = 2 * 1024 * 1024


def _sublane(dtype) -> int:
    """Native sublane packing for the dtype: 8 (4B), 16 (2B), 32 (1B)."""
    itemsize = jnp.dtype(dtype).itemsize
    return max(8, 32 // itemsize)


def _round_up(x: int, m: int) -> int:
    return ((x + m - 1) // m) * m


def _scale_kernel(lam_ref, g_ref, o_ref):
    # Backward of GradientReversalFunction: dx = lambda_ * grads.
    # lambda_ comes from SMEM (scalar slot, free); multiply in f32, cast on store.
    scale = lam_ref[0, 0]
    o_ref[...] = (g_ref[...].astype(jnp.float32) * scale).astype(o_ref.dtype)


def _scale_pallas(g, lam):
    """Elementwise dx = lam * g, streamed through a lane-dense Pallas kernel."""
    orig_shape = g.shape
    n = g.size
    if n == 0:
        return g

    lam_f32 = jnp.asarray(lam, dtype=jnp.float32)

    if n % _LANE != 0:
        # Ragged total size: a padded Pallas pass would cost ~3x HBM traffic
        # (pad + kernel + slice) on a purely memory-bound op. Let XLA fuse the
        # scale into the gradient producer instead.
        return (g.astype(jnp.float32) * lam_f32).astype(g.dtype).reshape(orig_shape)

    rows = n // _LANE
    slab = g.reshape(rows, _LANE)  # lane-dense slab; reshape is layout-free

    sub = _sublane(g.dtype)
    itemsize = jnp.dtype(g.dtype).itemsize
    max_tile_rows = max(sub, (_TARGET_BLOCK_BYTES // (_LANE * itemsize)) // sub * sub)

    if rows <= sub:
        # Single full-extent block (block shape == array shape is always legal).
        tile_rows = rows
    else:
        # At least 2 grid steps so the "parallel" axis can shard across the two
        # TensorCores of v7x (no-op on v5e/v6e); cap blocks at ~2 MiB. A partial
        # final block is masked automatically by Pallas.
        tile_rows = min(max_tile_rows, _round_up(pl.cdiv(rows, 2), sub))

    grid = (pl.cdiv(rows, tile_rows),)
    lam_smem = lam_f32.reshape(1, 1)

    out = pl.pallas_call(
        _scale_kernel,
        out_shape=jax.ShapeDtypeStruct(slab.shape, slab.dtype),
        grid_spec=pltpu.PrefetchScalarGridSpec(
            num_scalar_prefetch=0,
            grid=grid,
            in_specs=[
                pl.BlockSpec(memory_space=pltpu.MemorySpace.SMEM),  # lambda scalar
                pl.BlockSpec((tile_rows, _LANE), lambda i: (i, 0)),  # grads slab
            ],
            out_specs=pl.BlockSpec((tile_rows, _LANE), lambda i: (i, 0)),
        ),
        # Write the scaled gradient in place over the incoming cotangent buffer.
        input_output_aliases={1: 0},
        compiler_params=pltpu.CompilerParams(
            dimension_semantics=("parallel",),
        ),
    )(lam_smem, slab)

    return out.reshape(orig_shape)


@jax.custom_vjp
def gradient_reversal(x, lambda_):
    """Forward: identity. Backward: grads * lambda_ (caller passes -lambda)."""
    return x


def _grl_fwd(x, lambda_):
    # Identity forward — no copy kernel needed (JAX arrays are immutable).
    # lambda_ is saved as a runtime residual: works with Python floats and with
    # traced/annealed lambdas under jit, with no per-value recompilation.
    return x, lambda_


def _grl_bwd(lambda_, g):
    dx = _scale_pallas(g, lambda_)
    return (dx, jnp.zeros_like(jnp.asarray(lambda_)))


gradient_reversal.defvjp(_grl_fwd, _grl_bwd)


class GradientReversal:
    """Mirror of the PyTorch module: forward(x, lambda_)."""

    def __call__(self, x, lambda_):
        return gradient_reversal(x, lambda_)


if __name__ == "__main__":
    key = jax.random.PRNGKey(0)
    x = jax.random.normal(key, (2, 4, 16, 16), dtype=jnp.float32)
    lambda_ = 0.5

    grl = GradientReversal()

    # Forward: identity.
    y = grl(x, lambda_)
    jax.block_until_ready(y)
    assert y.shape == x.shape and y.dtype == x.dtype
    assert bool(jnp.allclose(y, x))

    # Backward: d/dx sum(y) == lambda_ * ones (matches GradientReversalFunction).
    gx = jax.grad(lambda a: jnp.sum(grl(a, lambda_)))(x)
    jax.block_until_ready(gx)
    assert bool(jnp.allclose(gx, jnp.full_like(x, lambda_)))

    # Traced (annealed) lambda under jit: same compiled kernel, new scalar.
    grad_fn = jax.jit(jax.grad(lambda a, lam: jnp.sum(grl(a, lam))))
    gx2 = grad_fn(x, jnp.float32(-0.75))
    gx3 = grad_fn(x, jnp.float32(1.5))
    jax.block_until_ready((gx2, gx3))
    assert bool(jnp.allclose(gx2, jnp.full_like(x, -0.75)))
    assert bool(jnp.allclose(gx3, jnp.full_like(x, 1.5)))

    # bf16 gradients (exercises dtype-aware sublane tiling + f32 compute path).
    xb = jax.random.normal(jax.random.PRNGKey(2), (8, 16, 32), dtype=jnp.bfloat16)
    gxb = jax.grad(lambda a: jnp.sum(grl(a, 2.0)))(xb)
    jax.block_until_ready(gxb)
    assert bool(jnp.allclose(gxb.astype(jnp.float32), jnp.full(xb.shape, 2.0)))

    # Ragged-size path (n not a multiple of 128 → fused XLA fallback).
    xr = jax.random.normal(jax.random.PRNGKey(1), (3, 5, 7), dtype=jnp.float32)
    gxr = jax.grad(lambda a: jnp.sum(grl(a, -1.25)))(xr)
    jax.block_until_ready(gxr)
    assert bool(jnp.allclose(gxr, jnp.full_like(xr, -1.25)))

    print("KERNEL_OK")
</pallas_src>

<mosaic_0001>
module attributes {stable_mosaic.version = 11 : i64} {
  func.func @_scale_kernel(%arg0: i32, %arg1: memref<1x1xf32, #tpu.memory_space<smem>>, %arg2: memref<8x128xf32, #tpu.memory_space<vmem>>, %arg3: memref<8x128xf32, #tpu.memory_space<vmem>>) attributes {dimension_semantics = [#tpu.dimension_semantics<parallel>], iteration_bounds = array<i64: 2>, scalar_prefetch = 0 : i64, scratch_operands = 0 : i64, tpu.core_type = #tpu.core_type<tc>, window_params = [{transform_indices = @transform_0, window_bounds = array<i64: 1, 1>}, {transform_indices = @transform_1, window_bounds = array<i64: 8, 128>}, {transform_indices = @transform_2, window_bounds = array<i64: 8, 128>}]} {
    %c0 = arith.constant 0 : index
    %c0_0 = arith.constant 0 : index
    %0 = memref.load %arg1[%c0, %c0_0] : memref<1x1xf32, #tpu.memory_space<smem>>
    %c0_1 = arith.constant 0 : index
    %c0_2 = arith.constant 0 : index
    %1 = vector.load %arg2[%c0_1, %c0_2] : memref<8x128xf32, #tpu.memory_space<vmem>>, vector<8x128xf32>
    %2 = vector.broadcast %0 : f32 to vector<8x128xf32>
    %3 = arith.mulf %1, %2 : vector<8x128xf32>
    %c0_3 = arith.constant 0 : index
    %c0_4 = arith.constant 0 : index
    %4 = vector.load %arg3[%c0_3, %c0_4] : memref<8x128xf32, #tpu.memory_space<vmem>>, vector<8x128xf32>
    tpu.vector_store %arg3[%c0_3, %c0_4], %3 {strides = array<i32>} : memref<8x128xf32, #tpu.memory_space<vmem>>, vector<8x128xf32>,
    return
  }
  func.func @transform_0(%arg0: i32) -> (i32, i32) {
    %c0_i32 = arith.constant 0 : i32
    %c0_i32_0 = arith.constant 0 : i32
    %c0_i32_1 = arith.constant 0 : i32
    return %c0_i32, %c0_i32_0 : i32, i32
  }
  func.func @transform_1(%arg0: i32) -> (i32, i32) {
    %c0_i32 = arith.constant 0 : i32
    %c0_i32_0 = arith.constant 0 : i32
    return %arg0, %c0_i32 : i32, i32
  }
  func.func @transform_2(%arg0: i32) -> (i32, i32) {
    %c0_i32 = arith.constant 0 : i32
    %c0_i32_0 = arith.constant 0 : i32
    return %arg0, %c0_i32 : i32, i32
  }
}

</mosaic_0001>

<bundles_post_ra>
// kernel: tpu_custom_call.1
= control target key start
LH: loop header
LB: loop body
LE: loop exit
PB: predicated region body
PF: predicated region fallthrough
CT: control target
= control target key end

     0   :  { %s554_s0 = inlined_call_operand.<no memory space> [shape: f32[1,1], index: 0, kind: input, shape index: {}]   ;;  %s555_s1 = inlined_call_operand.hbm [shape: f32[16,128], index: 1, kind: input, shape index: {}, may-alias: {1,2}]   ;;  %s556_s2 = inlined_call_operand.hbm [shape: f32[16,128], index: 2, kind: output, shape index: {}, may-alias: {1,2}]  }
   0x1   :  { %7 = sst [smem:[#allocation2]] %s554_s0 }
   0x2   :  { %8 = vsyncpa [#allocation4], 0 }
   0x3   :  { %10 = vsyncpa [#allocation4 + $0x1], 0 }
   0x4   :  { %11 = vsyncpa [#allocation5], 0 }
   0x5   :  { %13 = vsyncpa [#allocation5 + $0x1], 0  ;;  %s427_s11 = smov 0   ;;  %s429_s12 = smov 0  }
   0x6   :  { %s431_s13 = smov 0   ;;  %s433_s14 = smov 0  }
   0x7 LB: > { %s448_s0 = sadd.s32 4294967295, %s407_s14   ;;  %s253_s15 = sadd.s32 4294967294, %s407_s14   ;;  %s407_s14 = sphi %s433_s14, %s566_s14   ;;  %s403_s13 = sphi %s431_s13, %s565_s13   ;;  %s399_s12 = sphi %s429_s12, %s564_s12   ;;  %s395_s11 = sphi %s427_s11, %s563_s11  }
   0x8   : > { %s452_s16 = sadd.s32 1, %s407_s14   ;;  %s47_s17 = sadd.s32 1, %s403_s13 }
   0x9   : > { %s44_s18 = ssub.s32 %s407_s14, %s452_s16  ;;  %p54_p0 = scmp.ne.s32.totalorder %s403_s13, %s399_s12 }
   0xa   : > { %p45_p1 = scmp.eq.s32.totalorder %s44_s18, 0  ;;  %p55_p2 = scmp.eq.s32.totalorder %s407_s14, 0 }
   0xb   : > { %p60_p3 = scmp.ne.s32.totalorder %s399_s12, %s395_s11  ;;  %p61_p4 = scmp.eq.s32.totalorder %s448_s0, 0 }
   0xc   : > { %s464_s19 = scalar_select %p45_p1, %s403_s13, %s47_s17  }
   0xd   : > { %p466_p5 = por %p55_p2, %p54_p0  ;;  %p470_p6 = por %p61_p4, %p60_p3 }
   0xe   : > { %p84_p7 = scmp.eq.s32.totalorder %s448_s0, 1  ;;  %p90_p8 = scmp.eq.s32.totalorder %s253_s15, 1 }
   0xf   : > { %p277_p10 = scmp.lt.s32.totalorder %s407_s14, 2  ;;  %s113_s24 = sand.u32 1, %s403_s13  }
  0x10   : > { %p477_p11 = por %p84_p7, %p54_p0  ;;  %p481_p12 = por %p90_p8, %p60_p3 }
  0x11   : > { %s257_s25 = sshll.u32 %s407_s14, 3  ;;  %s256_s26 = sshll.u32 %s113_s24, 3 }
  0x12   : > { %s121_s29 = scalar_lea.hbm %s555_s1, %s257_s25  ;;  %s117_s3 = scalar_lea.vmem [#allocation3], %s256_s26 }
  0x13   : > { %s123_s30 = sshll.u32 %s121_s29, 4  ;;  %s125_s4 = sshll.u32 %s117_s3, 4  ;;  %s124_s30 = int_to_ptr.hbm [resolvable:$true] %s123_s30  ;;  %s126_s4 = int_to_ptr.vmem [resolvable:$true] %s125_s4 }
  0x14   : > { %p492_p13 = pnand %p277_p10, %p466_p5  ;;  %p258_p0 = scmp.ge.s32.totalorder %s407_s14, 1 }
  0x15   : > { %p130_p1 = scmp.lt.s32.totalorder %s407_s14, 3  ;;  %s114_s6 = scalar_lea.sflag [#allocation4], %s113_s24 }
  0x16   : > { %s311_s7 = sshra.s32 %s124_s30, 4  ;;  %p315_p3 = pneg %p492_p13  ;;  %s312_s7 = int_to_ptr.hbm [resolvable:$true] %s311_s7 }
  0x17   : > { %s313_s8 = scalar_lea.hbm %s312_s7, 8  ;;  %s318_s15 = scalar_lea.hbm %s555_s1, 16 }
  0x18   : > { %p314_p2 = scmp.ne.s32.totalorder %s312_s7, %s313_s8  ;;  %p319_p5 = scmp.lt.s32.totalorder %s312_s7, %s555_s1 }
  0x19   : > { %p320_p8 = scmp.lt.s32.totalorder %s318_s15, %s313_s8 }
  0x1a   : > { %p316_p4 = pnand %p315_p3, %p314_p2 }
  0x1b   : > { %p321_p10 = por %p320_p8, %p319_p5 }
  0x1c   : > { %p317_p7 = pneg %p316_p4 }
  0x1e   : > { %p322_p9 = pnand %p321_p10, %p317_p7 }
  0x20   : > { %325 = shalt.err (!%p322_p9)
}
  0x21   : > { %272 = dma.hbm_to_vmem [thread:$0]  (!%p492_p13), %s124_s30, 128, %s126_s4, %s114_s6  }
  0x22   : > { %p131_p2 = pnand %p258_p0, %p130_p1 }
  0x23   : > { %s513_s20 = sand.u32 (!%p131_p2), 1, %s399_s12  }
  0x24   : > { %134 = sbr.rel (%p131_p2) target bundleno = 57 (0x39), region = 28  ;;  %s259_s24 = sshll.u32 (!%p131_p2), %s513_s20, 3 }
  0x25   : > { %s137_s25 = scalar_lea.sflag (!%p131_p2), [#allocation4], %s513_s20  ;;  %s140_s26 = scalar_lea.vmem (!%p131_p2), [#allocation3], %s259_s24 }
  0x29   : > { %386 = dma.done.wait (%p470_p6), %s137_s25, 128  }
  0x2a   : > { %388 = vsyncadd (%p470_p6), %s137_s25, 4294967168  ;;  %s162_s27 = sld [smem:[#allocation2]]  ;;  %s262_s28 = sshll.u32 %s448_s0, 3  ;;  %v163_v0 = vld [vmem:[%s140_s26] sm:$0xff] }
  0x2b   : > { %s178_s3 = scalar_lea.hbm %s556_s2, %s262_s28  ;;  %s161_s4 = scalar_lea.vmem [#allocation6], %s259_s24 }
  0x2c   : > { %s180_s5 = sshll.u32 %s161_s4, 4  ;;  %s182_s6 = sshll.u32 %s178_s3, 4  ;;  %s181_s5 = int_to_ptr.vmem [resolvable:$true] %s180_s5  ;;  %s183_s6 = int_to_ptr.hbm [resolvable:$true] %s182_s6 }
  0x2d   : > { %s168_s21 = scalar_lea.sflag [#allocation5], %s513_s20  ;;  %s355_s7 = sshra.s32 %s183_s6, 4  ;;  %s356_s7 = int_to_ptr.hbm [resolvable:$true] %s355_s7 }
  0x2e   : > { %s357_s8 = scalar_lea.hbm %s356_s7, 8  ;;  %s361_s10 = scalar_lea.hbm %s556_s2, 16 }
  0x2f   : > { %p358_p6 = scmp.ne.s32.totalorder %s356_s7, %s357_s8  ;;  %p362_p0 = scmp.lt.s32.totalorder %s356_s7, %s556_s2 }
  0x30   : > { %v164_v1 = vstv %s162_s27  ;;  %p363_p1 = scmp.lt.s32.totalorder %s361_s10, %s357_s8 }
  0x31   : > { %v165_v2 = vmul.f32 %v164_v1, %v163_v0  ;;  %p359_p9 = pnand %p358_p6, %p477_p11 }
  0x32   : > { %p364_p3 = por %p363_p1, %p362_p0 }
  0x33   : > { %166 = vst [vmem:[%s161_s4] sm:$0xff] %v165_v2  ;;  %p360_p13 = pneg %p359_p9 }
  0x35   : > { %p365_p4 = pnand %p364_p3, %p360_p13 }
  0x37   : > { %368 = shalt.err (!%p365_p4)
}
  0x38   : > { %267 = dma.vmem_to_hbm [thread:$0]  (%p477_p11), %s181_s5, 128, %s183_s6, %s168_s21  }
  0x39 PF: > { %s194_s18 = sand.u32 1, %s395_s11   ;;  %p562_p7 = scmp.ge.s32.totalorder %s407_s14, 2 }
  0x3a   : > { %s195_s20 = scalar_lea.sflag [#allocation5], %s194_s18 }
  0x3b   : > { %p274_p5 = pnand %p562_p7, %p481_p12 }
  0x3d   : > { %p275_p8 = pneg %p274_p5 }
  0x3f   : > { %390 = dma.done.wait (%p275_p8), %s195_s20, 128  }
  0x40   : > { %392 = vsyncadd (%p275_p8), %s195_s20, 4294967168  ;;  %p16_p10 = scmp.ge.s32.totalorder %s452_s16, 4   ;;  %s563_s11 = smov %s399_s12 }
  0x41   : > { %s564_s12 = smov %s403_s13  ;;  %s565_s13 = smov %s464_s19 }
  0x42   : > { %s566_s14 = smov %s452_s16  ;;  %18 = sbr.rel (!%p16_p10) target bundleno = 7 (0x7), region = 73 }
  0x47   :  { %201 = vsyncpa [#allocation4], 1 }
  0x48   :  { %203 = vsyncpa [#allocation4 + $0x1], 1 }
  0x49   :  { %204 = vsyncpa [#allocation5], 1 }
  0x4a   :  { %206 = vsyncpa [#allocation5 + $0x1], 1 }

</bundles_post_ra>
